<compile_context>
chip_gen: v7x
topology: tpu7x:2x2x1
jax: 0.10.0
libtpu: 0.0.40
codegen_flags: <defaults>
</compile_context>

<pallas_src>
import functools

import jax
import jax.numpy as jnp
from jax.experimental import pallas as pl
from jax.experimental.pallas import tpu as pltpu


def _round_up(x, m):
    return ((x + m - 1) // m) * m


def _taps_accumulate(load, wdw_ref, k_taps):
    """acc[l, c] = sum_k load(k)[l, c] * w[k, c]; acc initialized from tap 0."""
    acc = load(0) * wdw_ref[pl.ds(0, 1), :]
    for k in range(1, k_taps):                       # static, small unrolled loop
        acc = acc + load(k) * wdw_ref[pl.ds(k, 1), :]
    return acc


def _finish(acc, bdw_ref, wpw_ref, bpw_ref):
    """Fused depthwise BN bias + ReLU -> 1x1 conv (MXU) -> BN bias + ReLU."""
    h = jnp.maximum(acc + bdw_ref[...], 0.0)
    y = jnp.dot(h.astype(jnp.bfloat16), wpw_ref[...],
                preferred_element_type=jnp.float32)
    return jnp.maximum(y + bpw_ref[...], 0.0)


def _dwsep_kernel(xb_ref, xh_ref, wdw_ref, bdw_ref, wpw_ref, bpw_ref, o_ref,
                  tail_ref, *, stride, k_taps, t_out):
    """One (batch, L-tile) grid step for K > stride (needs a K-1 halo).

    xb_ref : (1, TILE_S, C_in)   body of the input window (TILE_S = TILE_L*stride)
    xh_ref : (1, H, C_in)        halo: the H >= K-1 rows following the body
    wdw_ref: (K, C_in)           depthwise taps, BN scale folded in
    bdw_ref: (1, C_in)           fused BN bias (depthwise)
    wpw_ref: (C_in, C_out)       pointwise weights (bf16), BN scale folded in
    bpw_ref: (1, C_out)          fused BN bias (pointwise)
    o_ref  : (1, TILE_L, C_out)
    tail_ref: (t_out*stride + H, C_in) scratch holding only the boundary rows
    """
    tile_l = o_ref.shape[1]
    tile_s = xb_ref.shape[1]
    h_rows = xh_ref.shape[1]
    m_out = tile_l - t_out
    tail_s = t_out * stride

    # Main rows: every tap window stays inside the body block -> read taps
    # directly at small sublane offsets (no full-body staging copy).
    if m_out > 0:
        def load_main(k):
            if stride == 1:
                return xb_ref[0, pl.ds(k, m_out), :]
            return xb_ref[0, pl.ds(k, m_out, stride), :]
        y = _finish(_taps_accumulate(load_main, wdw_ref, k_taps),
                    bdw_ref, wpw_ref, bpw_ref)
        o_ref[0, pl.ds(0, m_out), :] = y.astype(o_ref.dtype)

    # Boundary rows: stage only the last t_out*stride body rows + the halo
    # contiguously in a tiny scratch so their taps are sublane-offset loads too.
    tail_ref[pl.ds(0, tail_s), :] = xb_ref[0, pl.ds(tile_s - tail_s, tail_s), :]
    tail_ref[pl.ds(tail_s, h_rows), :] = xh_ref[0]

    def load_tail(k):
        if stride == 1:
            return tail_ref[pl.ds(k, t_out), :]
        return tail_ref[pl.ds(k, t_out, stride), :]
    y = _finish(_taps_accumulate(load_tail, wdw_ref, k_taps),
                bdw_ref, wpw_ref, bpw_ref)
    o_ref[0, pl.ds(m_out, t_out), :] = y.astype(o_ref.dtype)


def _dwsep_kernel_nohalo(xb_ref, wdw_ref, bdw_ref, wpw_ref, bpw_ref, o_ref,
                         *, stride, k_taps):
    """Specialization for K <= stride (e.g. 1x1 layers): no halo, no scratch."""
    tile_l = o_ref.shape[1]

    def load(k):
        if stride == 1:
            return xb_ref[0, pl.ds(k, tile_l), :]
        return xb_ref[0, pl.ds(k, tile_l, stride), :]

    y = _finish(_taps_accumulate(load, wdw_ref, k_taps),
                bdw_ref, wpw_ref, bpw_ref)
    o_ref[0] = y.astype(o_ref.dtype)


def basic_depthwise_conv(x_ncl, w_dw, w_pw,
                         gamma_dw, beta_dw, mean_dw, var_dw,
                         gamma_pw, beta_pw, mean_pw, var_pw,
                         *, kernel_size, stride=1, padding='same', eps=1e-5,
                         tile_l=512):
    """x_ncl: (N, C_in, L) float32, matching torch Conv1d NCL layout.

    w_dw: (C_in, 1, K)      torch depthwise Conv1d weight (groups=C_in)
    w_pw: (C_out, C_in, 1)  torch 1x1 Conv1d weight
    Returns (N, C_out, L_out) in NCL layout.
    """
    n, c_in, l = x_ncl.shape
    c_out = w_pw.shape[0]

    # 'same' padding exactly as the module's ConstantPad1d((K//2, ceil(K/2)-1)).
    if padding == 'same' and kernel_size > 1:
        lpad = kernel_size // 2
        rpad = -(-kernel_size // 2) - 1
    else:
        lpad, rpad = 0, 0
    l_out = (lpad + l + rpad - kernel_size) // stride + 1

    # ---- tiling -------------------------------------------------------------
    need_halo = kernel_size > stride       # else the tap window never leaves the body
    sub = 8                                # f32 sublane tile (would be 16 for bf16)
    h_rows = _round_up(kernel_size - 1, sub) if need_halo else 0

    tl = _round_up(min(tile_l, l_out), sub)
    # Pipelining / megacore guard: aim for >= ~8 total grid steps if L allows.
    target_steps = 8
    if n * (-(-l_out // tl)) < target_steps:
        want_tiles = -(-target_steps // n)
        tl = max(sub, min(tl, _round_up(-(-l_out // want_tiles), sub)))
    if need_halo:
        tl = _round_up(tl, h_rows)          # keeps tile_s % h_rows == 0
    n_tiles = -(-l_out // tl)
    tile_s = tl * stride

    if need_halo:
        assert tile_s % h_rows == 0, (tile_s, h_rows)   # halo index-map invariant
        halo_blocks = tile_s // h_rows
        # Output rows whose tap window spills past the body ("tail" rows).
        last_main = (tile_s - kernel_size) // stride
        t_out = min(tl, _round_up(max(tl - 1 - last_main, 1), sub))
        tail_rows = t_out * stride + h_rows
    else:
        t_out = 0
        tail_rows = 0

    l_in_total = max(n_tiles * tile_s + h_rows, lpad + l)

    # ---- glue: layout + L padding + BN folding into the conv weights --------
    # NOTE: no channel padding in HBM -- blocks carry the real C_in / C_out.
    x_nlc = jnp.transpose(x_ncl, (0, 2, 1))                         # (N, L, C_in)
    x_nlc = jnp.pad(x_nlc, ((0, 0), (lpad, l_in_total - lpad - l), (0, 0)))

    s_dw = gamma_dw / jnp.sqrt(var_dw + eps)                        # (C_in,)
    b_dw = (beta_dw - mean_dw * s_dw).reshape(1, c_in)
    s_pw = gamma_pw / jnp.sqrt(var_pw + eps)                        # (C_out,)
    b_pw = (beta_pw - mean_pw * s_pw).reshape(1, c_out)
    wdw = jnp.transpose(w_dw[:, 0, :], (1, 0)) * s_dw[None, :]      # (K, C_in)
    wpw = (jnp.transpose(w_pw[:, :, 0], (1, 0))
           * s_pw[None, :]).astype(jnp.bfloat16)                    # (C_in, C_out)

    # ---- VMEM budget (generation-safe: <= 48 MiB so v7x keeps headroom) ------
    lane_in, lane_out = _round_up(c_in, 128), _round_up(c_out, 128)
    bpe = 4
    vmem_need = (2 * (tile_s + h_rows) * lane_in * bpe      # double-buffered input + halo
                 + 2 * tl * lane_out * bpe                  # double-buffered output
                 + tail_rows * lane_in * bpe                # boundary scratch
                 + (kernel_size + 8) * lane_in * bpe        # depthwise weights + bias
                 + lane_in * lane_out * 2                   # pointwise weights (bf16)
                 + (1 << 20))                               # margin
    vmem_limit = int(min(48 << 20, max(32 << 20, 2 * vmem_need)))

    # ---- Pallas call: grid over (batch, L-tiles), both parallel --------------
    body_spec = pl.BlockSpec((1, tile_s, c_in), lambda b, t: (b, t, 0))
    param_specs = [
        pl.BlockSpec((kernel_size, c_in), lambda b, t: (0, 0)),
        pl.BlockSpec((1, c_in), lambda b, t: (0, 0)),
        pl.BlockSpec((c_in, c_out), lambda b, t: (0, 0)),
        pl.BlockSpec((1, c_out), lambda b, t: (0, 0)),
    ]
    out_spec = pl.BlockSpec((1, tl, c_out), lambda b, t: (b, t, 0))

    if need_halo:
        halo_spec = pl.BlockSpec((1, h_rows, c_in),
                                 lambda b, t: (b, (t + 1) * halo_blocks, 0))
        kernel = functools.partial(_dwsep_kernel, stride=stride,
                                   k_taps=kernel_size, t_out=t_out)
        in_specs = [body_spec, halo_spec] + param_specs
        scratch_shapes = [pltpu.VMEM((tail_rows, c_in), x_nlc.dtype)]
        args = (x_nlc, x_nlc, wdw, b_dw, wpw, b_pw)
    else:
        kernel = functools.partial(_dwsep_kernel_nohalo, stride=stride,
                                   k_taps=kernel_size)
        in_specs = [body_spec] + param_specs
        scratch_shapes = []
        args = (x_nlc, wdw, b_dw, wpw, b_pw)

    out_nlc = pl.pallas_call(
        kernel,
        out_shape=jax.ShapeDtypeStruct((n, n_tiles * tl, c_out), x_ncl.dtype),
        grid=(n, n_tiles),
        in_specs=in_specs,
        out_specs=out_spec,
        scratch_shapes=scratch_shapes,
        compiler_params=pltpu.CompilerParams(
            dimension_semantics=("parallel", "parallel"),
            vmem_limit_bytes=vmem_limit),
    )(*args)

    out = out_nlc[:, :l_out, :]                       # drop L overshoot (if any)
    return jnp.transpose(out, (0, 2, 1))              # (N, C_out, L_out)


def _reference(x_ncl, w_dw, w_pw, gamma_dw, beta_dw, mean_dw, var_dw,
               gamma_pw, beta_pw, mean_pw, var_pw,
               *, kernel_size, stride=1, eps=1e-5):
    """Pure-JAX reference of the same (inference-BN) forward.

    The pointwise matmul uses bf16 operands (f32 accumulation) to mirror the
    kernel's MXU dtype.
    """
    lpad = 0 if kernel_size == 1 else kernel_size // 2
    rpad = 0 if kernel_size == 1 else (-(-kernel_size // 2) - 1)
    xp = jnp.pad(x_ncl, ((0, 0), (0, 0), (lpad, rpad)))
    n, c_in, l_pad = xp.shape
    l_out = (l_pad - kernel_size) // stride + 1
    # depthwise
    dw = jnp.zeros((n, c_in, l_out), jnp.float32)
    for k in range(kernel_size):
        sl = xp[:, :, k:k + stride * (l_out - 1) + 1:stride]
        dw = dw + sl * w_dw[None, :, 0, k][:, :, None]
    dw = (dw - mean_dw[None, :, None]) / jnp.sqrt(var_dw[None, :, None] + eps)
    dw = dw * gamma_dw[None, :, None] + beta_dw[None, :, None]
    dw = jnp.maximum(dw, 0.0)
    # pointwise (bf16 operands, f32 accumulation)
    pw = jnp.einsum('ncl,oc->nol', dw.astype(jnp.bfloat16),
                    w_pw[:, :, 0].astype(jnp.bfloat16),
                    preferred_element_type=jnp.float32)
    pw = (pw - mean_pw[None, :, None]) / jnp.sqrt(var_pw[None, :, None] + eps)
    pw = pw * gamma_pw[None, :, None] + beta_pw[None, :, None]
    return jnp.maximum(pw, 0.0)


if __name__ == "__main__":
    N, C_IN, C_OUT, K, STRIDE = 2, 4, 8, 3, 1

    key = jax.random.PRNGKey(0)
    ks = jax.random.split(key, 8)
    w_dw = jax.random.normal(ks[1], (C_IN, 1, K), jnp.float32) * 0.5       # convdw.weight
    w_pw = jax.random.normal(ks[2], (C_OUT, C_IN, 1), jnp.float32) * 0.5   # conv1x1.weight

    # BN params (torch defaults perturbed deterministically to exercise the fusion)
    gamma_dw = 1.0 + 0.1 * jax.random.normal(ks[3], (C_IN,), jnp.float32)
    beta_dw = 0.1 * jax.random.normal(ks[4], (C_IN,), jnp.float32)
    mean_dw = jnp.zeros((C_IN,), jnp.float32)
    var_dw = jnp.ones((C_IN,), jnp.float32)
    gamma_pw = 1.0 + 0.1 * jax.random.normal(ks[5], (C_OUT,), jnp.float32)
    beta_pw = jnp.zeros((C_OUT,), jnp.float32)
    mean_pw = jnp.zeros((C_OUT,), jnp.float32)
    var_pw = jnp.ones((C_OUT,), jnp.float32)
    bn = (gamma_dw, beta_dw, mean_dw, var_dw, gamma_pw, beta_pw, mean_pw, var_pw)

    # Test 1: small L (L=16), K=3 -> halo kernel, tail-only path.
    x16 = jax.random.normal(ks[0], (N, C_IN, 16), jnp.float32)
    out = basic_depthwise_conv(x16, w_dw, w_pw, *bn,
                               kernel_size=K, stride=STRIDE, padding='same')
    out = jax.block_until_ready(out)
    ref = _reference(x16, w_dw, w_pw, *bn, kernel_size=K, stride=STRIDE)
    assert out.shape == (N, C_OUT, 16), out.shape
    assert jnp.allclose(out, ref, atol=2e-2, rtol=2e-2), "mismatch vs reference (L=16)"

    # Test 2: multiple L-tiles (L=40, tile_l=16) -> main/tail split + cross-tile halo.
    x40 = jax.random.normal(jax.random.PRNGKey(1), (N, C_IN, 40), jnp.float32)
    out2 = basic_depthwise_conv(x40, w_dw, w_pw, *bn,
                                kernel_size=K, stride=STRIDE, padding='same',
                                tile_l=16)
    out2 = jax.block_until_ready(out2)
    ref2 = _reference(x40, w_dw, w_pw, *bn, kernel_size=K, stride=STRIDE)
    assert out2.shape == (N, C_OUT, 40), out2.shape
    assert jnp.allclose(out2, ref2, atol=2e-2, rtol=2e-2), "mismatch vs reference (L=40)"

    # Test 3: kernel_size=1 specialization (no halo fetch, no scratch).
    w_dw1 = jax.random.normal(ks[6], (C_IN, 1, 1), jnp.float32) * 0.5
    out3 = basic_depthwise_conv(x16, w_dw1, w_pw, *bn,
                                kernel_size=1, stride=1, padding='same')
    out3 = jax.block_until_ready(out3)
    ref3 = _reference(x16, w_dw1, w_pw, *bn, kernel_size=1, stride=1)
    assert out3.shape == (N, C_OUT, 16), out3.shape
    assert jnp.allclose(out3, ref3, atol=2e-2, rtol=2e-2), "mismatch vs reference (K=1)"

    print("KERNEL_OK")
</pallas_src>

<mosaic_0001>
module attributes {stable_mosaic.version = 11 : i64} {
  func.func @_dwsep_kernel(%arg0: i32, %arg1: i32, %arg2: memref<1x8x4xf32, #tpu.memory_space<vmem>>, %arg3: memref<1x8x4xf32, #tpu.memory_space<vmem>>, %arg4: memref<3x4xf32, #tpu.memory_space<vmem>>, %arg5: memref<1x4xf32, #tpu.memory_space<vmem>>, %arg6: memref<4x8xbf16, #tpu.memory_space<vmem>>, %arg7: memref<1x8xf32, #tpu.memory_space<vmem>>, %arg8: memref<1x8x8xf32, #tpu.memory_space<vmem>>, %arg9: memref<16x4xf32, #tpu.memory_space<vmem>>) attributes {dimension_semantics = [#tpu.dimension_semantics<parallel>, #tpu.dimension_semantics<parallel>], iteration_bounds = array<i64: 2, 2>, scalar_prefetch = 0 : i64, scratch_operands = 1 : i64, tpu.core_type = #tpu.core_type<tc>, window_params = [{transform_indices = @transform_0, window_bounds = array<i64: 1, 8, 4>}, {transform_indices = @transform_1, window_bounds = array<i64: 1, 8, 4>}, {pipeline_mode = #tpu.pipeline_mode<synchronous>, transform_indices = @transform_2, window_bounds = array<i64: 3, 4>}, {pipeline_mode = #tpu.pipeline_mode<synchronous>, transform_indices = @transform_3, window_bounds = array<i64: 1, 4>}, {pipeline_mode = #tpu.pipeline_mode<synchronous>, transform_indices = @transform_4, window_bounds = array<i64: 4, 8>}, {pipeline_mode = #tpu.pipeline_mode<synchronous>, transform_indices = @transform_5, window_bounds = array<i64: 1, 8>}, {transform_indices = @transform_6, window_bounds = array<i64: 1, 8, 8>}]} {
    %c0 = arith.constant 0 : index
    %c0_0 = arith.constant 0 : index
    %c0_1 = arith.constant 0 : index
    %0 = vector.load %arg2[%c0, %c0_0, %c0_1] : memref<1x8x4xf32, #tpu.memory_space<vmem>>, vector<1x8x4xf32>
    %1 = vector.shape_cast %0 : vector<1x8x4xf32> to vector<8x4xf32>
    %c0_2 = arith.constant 0 : index
    %c0_3 = arith.constant 0 : index
    %2 = vector.load %arg9[%c0_2, %c0_3] : memref<16x4xf32, #tpu.memory_space<vmem>>, vector<8x4xf32>
    tpu.vector_store %arg9[%c0_2, %c0_3], %1 {strides = array<i32>} : memref<16x4xf32, #tpu.memory_space<vmem>>, vector<8x4xf32>,
    %c0_4 = arith.constant 0 : index
    %c0_5 = arith.constant 0 : index
    %c0_6 = arith.constant 0 : index
    %3 = vector.load %arg3[%c0_4, %c0_5, %c0_6] : memref<1x8x4xf32, #tpu.memory_space<vmem>>, vector<1x8x4xf32>
    %4 = vector.shape_cast %3 : vector<1x8x4xf32> to vector<8x4xf32>
    %c8 = arith.constant 8 : index
    %c0_7 = arith.constant 0 : index
    %5 = vector.load %arg9[%c8, %c0_7] : memref<16x4xf32, #tpu.memory_space<vmem>>, vector<8x4xf32>
    tpu.vector_store %arg9[%c8, %c0_7], %4 {strides = array<i32>} : memref<16x4xf32, #tpu.memory_space<vmem>>, vector<8x4xf32>,
    %c0_8 = arith.constant 0 : index
    %c0_9 = arith.constant 0 : index
    %6 = vector.load %arg9[%c0_8, %c0_9] : memref<16x4xf32, #tpu.memory_space<vmem>>, vector<8x4xf32>
    %c0_10 = arith.constant 0 : index
    %c0_11 = arith.constant 0 : index
    %7 = vector.load %arg4[%c0_10, %c0_11] : memref<3x4xf32, #tpu.memory_space<vmem>>, vector<1x4xf32>
    %8 = vector.broadcast %7 : vector<1x4xf32> to vector<8x4xf32>
    %9 = arith.mulf %6, %8 : vector<8x4xf32>
    %c1 = arith.constant 1 : index
    %c0_12 = arith.constant 0 : index
    %10 = vector.load %arg9[%c1, %c0_12] : memref<16x4xf32, #tpu.memory_space<vmem>>, vector<8x4xf32>
    %c1_13 = arith.constant 1 : index
    %c0_14 = arith.constant 0 : index
    %11 = vector.load %arg4[%c1_13, %c0_14] : memref<3x4xf32, #tpu.memory_space<vmem>>, vector<1x4xf32>
    %12 = vector.broadcast %11 : vector<1x4xf32> to vector<8x4xf32>
    %13 = arith.mulf %10, %12 : vector<8x4xf32>
    %14 = arith.addf %9, %13 : vector<8x4xf32>
    %c2 = arith.constant 2 : index
    %c0_15 = arith.constant 0 : index
    %15 = vector.load %arg9[%c2, %c0_15] : memref<16x4xf32, #tpu.memory_space<vmem>>, vector<8x4xf32>
    %c2_16 = arith.constant 2 : index
    %c0_17 = arith.constant 0 : index
    %16 = vector.load %arg4[%c2_16, %c0_17] : memref<3x4xf32, #tpu.memory_space<vmem>>, vector<1x4xf32>
    %17 = vector.broadcast %16 : vector<1x4xf32> to vector<8x4xf32>
    %18 = arith.mulf %15, %17 : vector<8x4xf32>
    %19 = arith.addf %14, %18 : vector<8x4xf32>
    %c0_18 = arith.constant 0 : index
    %c0_19 = arith.constant 0 : index
    %20 = vector.load %arg5[%c0_18, %c0_19] : memref<1x4xf32, #tpu.memory_space<vmem>>, vector<1x4xf32>
    %21 = vector.broadcast %20 : vector<1x4xf32> to vector<8x4xf32>
    %22 = arith.addf %19, %21 : vector<8x4xf32>
    %cst = arith.constant 0.000000e+00 : f32
    %23 = vector.broadcast %cst : f32 to vector<8x4xf32>
    %24 = arith.maximumf %22, %23 : vector<8x4xf32>
    %25 = arith.truncf %24 : vector<8x4xf32> to vector<8x4xbf16>
    %c0_20 = arith.constant 0 : index
    %c0_21 = arith.constant 0 : index
    %26 = vector.load %arg6[%c0_20, %c0_21] : memref<4x8xbf16, #tpu.memory_space<vmem>>, vector<4x8xbf16>
    %cst_22 = arith.constant dense<0.000000e+00> : vector<8x8xf32>
    %27 = tpu.matmul %25, %26, %cst_22 {dimension_numbers = #tpu.dot_dimension_numbers<[1], [0], [0], [1], [0, 0, 1, 1], [], []>} : vector<8x4xbf16>, vector<4x8xbf16>, vector<8x8xf32> -> vector<8x8xf32>
    %c0_23 = arith.constant 0 : index
    %c0_24 = arith.constant 0 : index
    %28 = vector.load %arg7[%c0_23, %c0_24] : memref<1x8xf32, #tpu.memory_space<vmem>>, vector<1x8xf32>
    %29 = vector.broadcast %28 : vector<1x8xf32> to vector<8x8xf32>
    %30 = arith.addf %27, %29 : vector<8x8xf32>
    %cst_25 = arith.constant 0.000000e+00 : f32
    %31 = vector.broadcast %cst_25 : f32 to vector<8x8xf32>
    %32 = arith.maximumf %30, %31 : vector<8x8xf32>
    %c0_26 = arith.constant 0 : index
    %c0_27 = arith.constant 0 : index
    %c0_28 = arith.constant 0 : index
    %33 = vector.load %arg8[%c0_26, %c0_27, %c0_28] : memref<1x8x8xf32, #tpu.memory_space<vmem>>, vector<1x8x8xf32>
    %34 = vector.shape_cast %33 : vector<1x8x8xf32> to vector<8x8xf32>
    %35 = vector.shape_cast %32 : vector<8x8xf32> to vector<1x8x8xf32>
    tpu.vector_store %arg8[%c0_26, %c0_27, %c0_28], %35 {strides = array<i32>} : memref<1x8x8xf32, #tpu.memory_space<vmem>>, vector<1x8x8xf32>,
    return
  }
  func.func @transform_0(%arg0: i32, %arg1: i32) -> (i32, i32, i32) {
    %c0_i32 = arith.constant 0 : i32
    %c0_i32_0 = arith.constant 0 : i32
    return %arg0, %arg1, %c0_i32 : i32, i32, i32
  }
  func.func @transform_1(%arg0: i32, %arg1: i32) -> (i32, i32, i32) {
    %c1_i32 = arith.constant 1 : i32
    %0 = arith.addi %arg1, %c1_i32 : i32
    %c1_i32_0 = arith.constant 1 : i32
    %1 = arith.muli %0, %c1_i32_0 : i32
    %c0_i32 = arith.constant 0 : i32
    %c0_i32_1 = arith.constant 0 : i32
    return %arg0, %1, %c0_i32 : i32, i32, i32
  }
  func.func @transform_2(%arg0: i32, %arg1: i32) -> (i32, i32) {
    %c0_i32 = arith.constant 0 : i32
    %c0_i32_0 = arith.constant 0 : i32
    %c0_i32_1 = arith.constant 0 : i32
    return %c0_i32, %c0_i32_0 : i32, i32
  }
  func.func @transform_3(%arg0: i32, %arg1: i32) -> (i32, i32) {
    %c0_i32 = arith.constant 0 : i32
    %c0_i32_0 = arith.constant 0 : i32
    %c0_i32_1 = arith.constant 0 : i32
    return %c0_i32, %c0_i32_0 : i32, i32
  }
  func.func @transform_4(%arg0: i32, %arg1: i32) -> (i32, i32) {
    %c0_i32 = arith.constant 0 : i32
    %c0_i32_0 = arith.constant 0 : i32
    %c0_i32_1 = arith.constant 0 : i32
    return %c0_i32, %c0_i32_0 : i32, i32
  }
  func.func @transform_5(%arg0: i32, %arg1: i32) -> (i32, i32) {
    %c0_i32 = arith.constant 0 : i32
    %c0_i32_0 = arith.constant 0 : i32
    %c0_i32_1 = arith.constant 0 : i32
    return %c0_i32, %c0_i32_0 : i32, i32
  }
  func.func @transform_6(%arg0: i32, %arg1: i32) -> (i32, i32, i32) {
    %c0_i32 = arith.constant 0 : i32
    %c0_i32_0 = arith.constant 0 : i32
    return %arg0, %arg1, %c0_i32 : i32, i32, i32
  }
}

</mosaic_0001>

<bundles_post_ra>
// kernel: tpu_custom_call.1
= control target key start
LH: loop header
LB: loop body
LE: loop exit
PB: predicated region body
PF: predicated region fallthrough
CT: control target
= control target key end

     0   :  { %s667_s21 = smov 0   ;;  %s669_s22 = smov 0   ;;  %s753_s0 = inlined_call_operand.vmem [shape: f32[2,24,4], index: 0, kind: input, shape index: {}]   ;;  %s754_s1 = inlined_call_operand.vmem [shape: f32[2,24,4], index: 1, kind: input, shape index: {}]   ;;  %s755_s2 = inlined_call_operand.vmem [shape: f32[3,4], index: 2, kind: input, shape index: {}]   ;;  %s756_s3 = inlined_call_operand.vmem [shape: f32[1,4], index: 3, kind: input, shape index: {}]   ;;  %s757_s4 = inlined_call_operand.vmem [shape: bf16[4,8], index: 4, kind: input, shape index: {}]   ;;  %s758_s5 = inlined_call_operand.vmem [shape: f32[1,8], index: 5, kind: input, shape index: {}]   ;;  %s759_s6 = inlined_call_operand.vmem [shape: f32[2,16,8], index: 6, kind: output, shape index: {}]  }
   0x1   :  { %s671_s23 = smov 0   ;;  %s673_s24 = smov 0  }
   0x2   :  { %s675_s25 = smov 0  }
   0x3 LB: > { %s25_s26 = sadd.s32 1, %s620_s23  ;;  %s28_s27 = sadd.s32 1, %s624_s24  ;;  %s628_s25 = sphi %s675_s25, %s16_s25   ;;  %s624_s24 = sphi %s673_s24, %s763_s24   ;;  %s620_s23 = sphi %s671_s23, %s762_s23   ;;  %s616_s22 = sphi %s669_s22, %s761_s22   ;;  %s612_s21 = sphi %s667_s21, %s760_s21  }
   0x4   : > { %p26_p0 = scmp.ge.s32.totalorder %s25_s26, 2  ;;  %p526_p1 = scmp.ge.s32.totalorder %s628_s25, 1 }
   0x5   : > { %p250_p2 = scmp.lt.s32.totalorder %s628_s25, 5 }
   0x6   : > { %s765_s26 = smov (%p26_p0, %s25_s26), 0  ;;  %s767_s27 = smov (!%p26_p0, %s28_s27), %s624_s24 }
   0x7   : > { %p251_p3 = pnand %p526_p1, %p250_p2  ;;  %p30_p4 = scmp.ge.s32.totalorder %s767_s27, 2 }
   0x8   : > { %v360_v0 = vld [vmem:[%s757_s4] sm:$0x3] (!%p251_p3)  ;;  %vm371_vm0 = vcmask (!%p251_p3), 1041408   ;;  %p295_p5 = scmp.lt.s32.totalorder (!%p251_p3), %s616_s22, 1  ;;  %v630_v1 = vmov (!%p251_p3), 0.0   ;;  %vm631_vm1 = vmmov (!%p251_p3), 0  }
   0x9   : > { %s769_s27 = smov (%p30_p4, %s767_s27), 0  ;;  %254 = sbr.rel (%p251_p3) target bundleno = 262 (0x106), region = 44 }
   0xa   : > { %541 = vmatprep.subr.bf16.mxu0 (!%p251_p3), %v630_v1  ;;  %v373_v2 = vsel (!%p251_p3), %vm371_vm0, %v360_v0, 0  ;;  %543 = vmatprep.mubr.msk.bf16.mxu0 (!%p251_p3), %vm631_vm1, %v630_v1  ;;  %p297_p6 = scmp.lt.s32.totalorder (!%p251_p3), %s612_s21, 2  ;;  %s303_s30 = sadd.s32 (!%p251_p3), 1, %s612_s21  ;;  %vm323_vm2 = vcmask (!%p251_p3), 31744   ;;  %v531_v6 = vld [vmem:[%s755_s2] ss:$0 sm:$0xff] (!%p251_p3) }
   0xb   : > { %542 = vmatpush3.bf16.msra.mxu0 (!%p251_p3), %v373_v2  ;;  %p306_p7 = scmp.lt.s32.totalorder (!%p251_p3), %s303_s30, 2  ;;  %v532_v7 = vld [vmem:[%s755_s2 + $0x1] ss:$0 sm:$0xff] (!%p251_p3)  ;;  %v533_v8 = vld [vmem:[%s755_s2 + $0x2] ss:$0 sm:$0xff] (!%p251_p3)  ;;  %p315_p8 = scmp.lt.s32.totalorder (!%p251_p3), %s612_s21, 1 }
   0xc   : > { %v534_v15 = vld [vmem:[%s756_s3] ss:$0 sm:$0xff] (!%p251_p3)  ;;  %vm416_vm3 = vcmask (!%p251_p3), 64512  }
   0xd   : > { %v535_v20 = vld [vmem:[%s758_s5] ss:$0 sm:$0xff] (!%p251_p3) }
  0x10   : > { %s771_s22 = smov (!%p295_p5, %s616_s22), 1  ;;  %s773_s30 = smov (!%p306_p7, %s303_s30), 2 }
  0x11   : > { %s298_s7 = scalar_select %p297_p6, %s612_s21, 2 }
  0x12   : > { %s547_s8 = smul.u32 3, %s771_s22  ;;  %s775_s21 = smov (!%p315_p8, %s612_s21), 1 }
  0x14   : > { %s300_s9 = sadd.s32 %s547_s8, %s298_s7  ;;  %s309_s14 = sadd.s32 %s547_s8, %s773_s30 }
  0x15   : > { %s527_s10 = sshll.u32 %s300_s9, 3  ;;  %s528_s15 = sshll.u32 %s309_s14, 3 }
  0x16   : > { %s302_s13 = scalar_lea.vmem %s753_s0, %s527_s10  ;;  %s311_s18 = scalar_lea.vmem %s754_s1, %s528_s15 }
  0x17   : > { %v322_v3 = vld [vmem:[%s302_s13] sm:$0xff]  ;;  %s529_s10 = sshll.u32 %s771_s22, 1 }
  0x18   : > { %324 = vst.msk [vmem:[#allocation2] sm:$0xff] %vm323_vm2, %v322_v3  ;;  %v325_v4 = vld [vmem:[%s311_s18] sm:$0xff]  ;;  %s318_s11 = sadd.s32 %s529_s10, %s775_s21 }
  0x19   : > { %326 = vst.msk [vmem:[#allocation2 + $0x8] sm:$0xff] %vm323_vm2, %v325_v4  ;;  %s530_s14 = sshll.u32 %s318_s11, 3 }
  0x1a   : > { %s320_s17 = scalar_lea.vmem %s759_s6, %s530_s14 }
  0x1f   : > { %v327_v5 = vld [vmem:[#allocation2] sm:$0xff] }
  0x20   : > { %v333_v9 = vmul.f32 %v531_v6, %v327_v5  ;;  %v334_v10 = vld [vmem:[#allocation2 + $0x1] sm:$0xff] }
  0x21   : > { %v342_v11 = vld [vmem:[#allocation2 + $0x2] sm:$0xff]  ;;  %v340_v12 = vmul.f32 %v532_v7, %v334_v10 }
  0x22   : > { %v348_v13 = vmul.f32 %v533_v8, %v342_v11 }
  0x23   : > { %v341_v14 = vadd.f32 %v340_v12, %v333_v9 }
  0x25   : > { %v349_v16 = vadd.f32 %v348_v13, %v341_v14 }
  0x27   : > { %v357_v17 = vadd.f32 %v534_v15, %v349_v16 }
  0x29   : > { %v358_v18 = vmax.f32 %v357_v17, 0.0 }
  0x2b   : > { %v359_v19 = vpack.c.bf16 %v358_v18, %v358_v18 }
  0x2d   : > { %544 = vmatmul.mubr.msk.bf16.vlgmr.msra.gmra.mrb[0].mxu0 %vm323_vm2, %v359_v19 }
 0x100   : > { %v409_v21 = vpop.f32.mrb[0].mxu0 }
 0x101   : > { %v410_v22 = vadd.f32 %v535_v20, %v409_v21  ;;  %v545_v23 = vpop.f32.mrb[1].mxu0 }
 0x102   : > { %v412_v24 = vpop.f32.mrb[2].mxu0 }
 0x103   : > { %v415_v25 = vmax.f32 %v410_v22, 0.0  ;;  %v546_v26 = vpop.f32.mrb[3].mxu0 }
 0x105   : > { %417 = vst.msk [vmem:[%s320_s17] sm:$0xff] %vm416_vm3, %v415_v25 }
 0x106 PF: > { %s16_s25 = sadd.s32 1, %s628_s25   ;;  %s760_s21 = smov %s620_s23 }
 0x107   : > { %p13_p9 = scmp.ge.s32.totalorder %s16_s25, 6   ;;  %s761_s22 = smov %s624_s24 }
 0x108   : > { %s762_s23 = smov %s765_s26  ;;  %s763_s24 = smov %s769_s27 }
 0x109   :  { %15 = sbr.rel (!%p13_p9) target bundleno = 3 (0x3), region = 77 }

</bundles_post_ra>
